<compile_context>
chip_gen: v7x
topology: tpu7x:2x2x1
jax: 0.10.0
libtpu: 0.0.40
codegen_flags: <defaults>
</compile_context>

<pallas_src>
import functools

import jax
import jax.numpy as jnp
from jax.experimental import pallas as pl
from jax.experimental.pallas import tpu as pltpu


def _round_up(x, m):
    return (x + m - 1) // m * m


def _container_kernel(x_ref, w_ref, bm_ref, o_ref, w_acc_ref, *, inv_n):
    """Grid = (d_out_tile j [parallel], client_block c [arbitrary, innermost]).

    x_ref:     (B_pad, d_in)        compute dtype (bf16)
    w_ref:     (Cb, d_in, tn)       compute dtype (bf16) -- this step's clients
    bm_ref:    (1, tn)              f32 mean bias for this d_out tile
    o_ref:     (B_pad, tn)          output tile (written on last client block)
    w_acc_ref: (d_in, tn) f32       resident weight-sum accumulator
    """
    c = pl.program_id(1)

    @pl.when(c == 0)
    def _():
        w_acc_ref[...] = jnp.zeros_like(w_acc_ref)

    # Reduce this block of clients' weights into the f32 accumulator (VPU).
    w_acc_ref[...] += jnp.sum(w_ref[...].astype(jnp.float32), axis=0)

    @pl.when(c == pl.num_programs(1) - 1)
    def _():
        # Single MXU matmul per output tile:  x @ mean_c(W_c) + mean_c(b_c)
        w_mean = (w_acc_ref[...] * inv_n).astype(x_ref.dtype)
        y = jnp.dot(x_ref[...], w_mean, preferred_element_type=jnp.float32)
        y = y + bm_ref[...]
        o_ref[...] = y.astype(o_ref.dtype)


@functools.partial(jax.jit, static_argnames=("compute_dtype",))
def container_forward(x, weights, biases, *, compute_dtype=jnp.bfloat16):
    """x: (B, D_in); weights: (C, D_in, D_out); biases: (C, D_out)."""
    n_clients, d_in, d_out = weights.shape
    batch = x.shape[0]
    out_dtype = x.dtype
    itemsize = jnp.dtype(compute_dtype).itemsize

    # ---- lane/sublane-dense padding -------------------------------------
    b_pad = _round_up(batch, 16)           # sublane-dense rows (bf16 packing)
    d_out_pad = _round_up(d_out, 128)      # lane-dense output columns

    # ---- tile sizing (conservative VMEM budget, fits v5e/v6e/v7x) -------
    tn = 256 if d_out_pad % 256 == 0 else 128
    per_client_bytes = d_in * tn * itemsize
    # Keep each (double-buffered) weight block <= ~2 MiB and <= 8 clients so
    # the f32 upcast of the block stays small.
    cb = max(1, min(n_clients, 8, (2 * 1024 * 1024) // max(per_client_bytes, 1)))
    c_pad = _round_up(n_clients, cb)
    # TODO(synk): very large d_in would additionally need a K-tiled variant
    # (tile d_in with a y-accumulator); untiled d_in is fine at these sizes.

    # ---- pad / cast inputs ----------------------------------------------
    x_p = jnp.pad(x.astype(compute_dtype), ((0, b_pad - batch), (0, 0)))
    w_p = jnp.pad(
        weights.astype(compute_dtype),
        ((0, c_pad - n_clients), (0, 0), (0, d_out_pad - d_out)),
    )
    bias_mean = jnp.mean(biases.astype(jnp.float32), axis=0)
    bm_p = jnp.pad(bias_mean, (0, d_out_pad - d_out)).reshape(1, d_out_pad)

    grid = (d_out_pad // tn, c_pad // cb)   # (parallel, arbitrary/reduction-last)
    inv_n = 1.0 / float(n_clients)          # padded clients have zero weights

    kernel = functools.partial(_container_kernel, inv_n=inv_n)

    grid_spec = pltpu.PrefetchScalarGridSpec(
        num_scalar_prefetch=0,
        grid=grid,
        in_specs=[
            pl.BlockSpec((b_pad, d_in), lambda j, c: (0, 0)),       # x (resident)
            pl.BlockSpec((cb, d_in, tn), lambda j, c: (c, 0, j)),   # client weights
            pl.BlockSpec((1, tn), lambda j, c: (0, j)),             # mean bias
        ],
        out_specs=pl.BlockSpec((b_pad, tn), lambda j, c: (0, j)),
        scratch_shapes=[pltpu.VMEM((d_in, tn), jnp.float32)],
    )

    out = pl.pallas_call(
        kernel,
        out_shape=jax.ShapeDtypeStruct((b_pad, d_out_pad), out_dtype),
        grid_spec=grid_spec,
        compiler_params=pltpu.CompilerParams(
            dimension_semantics=("parallel", "arbitrary"),
        ),
    )(x_p, w_p, bm_p)

    return out[:batch, :d_out]


if __name__ == "__main__":
    # Small, deterministic setup consistent with the module's forward().
    n_clients = 4
    batch = 8
    d_in = 32      # fanin
    d_out = 32

    key = jax.random.PRNGKey(0)
    kx, kw, kb = jax.random.split(key, 3)

    x = jax.random.normal(kx, (batch, d_in), dtype=jnp.float32)

    # reset_parameters(): every param = 1/sqrt(fanin) * randn.
    scale = 1.0 / jnp.sqrt(jnp.float32(d_in))
    weights = scale * jax.random.normal(kw, (n_clients, d_in, d_out), dtype=jnp.float32)
    biases = scale * jax.random.normal(kb, (n_clients, d_out), dtype=jnp.float32)

    out = container_forward(x, weights, biases)
    out = jax.block_until_ready(out)

    # Pure-JAX f32 reference: mean over clients of (x @ W_c + b_c).
    ref = jnp.mean(
        jnp.einsum("bi,cio->cbo", x, weights) + biases[:, None, :], axis=0
    )
    assert out.shape == (batch, d_out)
    # Tolerance sized for the bf16 compute path (f32 accumulation inside).
    assert jnp.allclose(out, ref, atol=4e-2, rtol=4e-2), "mismatch vs reference"

    # TODO(synk): loss/backward/aggregate_gradients/random_neighbors are
    # training-time graph ops (per-client autograd + gossip averaging), not
    # part of forward(); not kernelized.
    print("KERNEL_OK")
</pallas_src>

<mosaic_0001>
module attributes {stable_mosaic.version = 11 : i64} {
  func.func @_container_kernel(%arg0: i32, %arg1: i32, %arg2: memref<16x32xbf16, #tpu.memory_space<vmem>>, %arg3: memref<4x32x128xbf16, #tpu.memory_space<vmem>>, %arg4: memref<1x128xf32, #tpu.memory_space<vmem>>, %arg5: memref<16x128xf32, #tpu.memory_space<vmem>>, %arg6: memref<32x128xf32, #tpu.memory_space<vmem>>) attributes {dimension_semantics = [#tpu.dimension_semantics<parallel>, #tpu.dimension_semantics<arbitrary>], iteration_bounds = array<i64: 1, 1>, scalar_prefetch = 0 : i64, scratch_operands = 1 : i64, tpu.core_type = #tpu.core_type<tc>, window_params = [{pipeline_mode = #tpu.pipeline_mode<synchronous>, transform_indices = @transform_0, window_bounds = array<i64: 16, 32>}, {transform_indices = @transform_1, window_bounds = array<i64: 4, 32, 128>}, {transform_indices = @transform_2, window_bounds = array<i64: 1, 128>}, {transform_indices = @transform_3, window_bounds = array<i64: 16, 128>}]} {
    %c0_i32 = arith.constant 0 : i32
    %0 = arith.cmpi eq, %arg1, %c0_i32 : i32
    %1 = arith.extui %0 : i1 to i32
    %c0_i32_0 = arith.constant 0 : i32
    %2 = arith.cmpi ne, %1, %c0_i32_0 : i32
    scf.if %2 {
      %cst_9 = arith.constant 0.000000e+00 : f32
      %12 = vector.broadcast %cst_9 : f32 to vector<32x128xf32>
      %c0_10 = arith.constant 0 : index
      %c0_11 = arith.constant 0 : index
      %13 = vector.load %arg6[%c0_10, %c0_11] : memref<32x128xf32, #tpu.memory_space<vmem>>, vector<32x128xf32>
      tpu.vector_store %arg6[%c0_10, %c0_11], %12 {strides = array<i32>} : memref<32x128xf32, #tpu.memory_space<vmem>>, vector<32x128xf32>,
    } else {
    }
    %c0 = arith.constant 0 : index
    %c0_1 = arith.constant 0 : index
    %3 = vector.load %arg6[%c0, %c0_1] : memref<32x128xf32, #tpu.memory_space<vmem>>, vector<32x128xf32>
    %c0_2 = arith.constant 0 : index
    %c0_3 = arith.constant 0 : index
    %c0_4 = arith.constant 0 : index
    %4 = vector.load %arg3[%c0_2, %c0_3, %c0_4] : memref<4x32x128xbf16, #tpu.memory_space<vmem>>, vector<4x32x128xbf16>
    %5 = arith.extf %4 : vector<4x32x128xbf16> to vector<4x32x128xf32>
    %cst = arith.constant dense<0.000000e+00> : vector<32x128xf32>
    %6 = vector.multi_reduction <add>, %5, %cst [0] : vector<4x32x128xf32> to vector<32x128xf32>
    %7 = arith.addf %3, %6 : vector<32x128xf32>
    %c0_5 = arith.constant 0 : index
    %c0_6 = arith.constant 0 : index
    %8 = vector.load %arg6[%c0_5, %c0_6] : memref<32x128xf32, #tpu.memory_space<vmem>>, vector<32x128xf32>
    tpu.vector_store %arg6[%c0_5, %c0_6], %7 {strides = array<i32>} : memref<32x128xf32, #tpu.memory_space<vmem>>, vector<32x128xf32>,
    %c0_i32_7 = arith.constant 0 : i32
    %9 = arith.cmpi eq, %arg1, %c0_i32_7 : i32
    %10 = arith.extui %9 : i1 to i32
    %c0_i32_8 = arith.constant 0 : i32
    %11 = arith.cmpi ne, %10, %c0_i32_8 : i32
    scf.if %11 {
      %c0_9 = arith.constant 0 : index
      %c0_10 = arith.constant 0 : index
      %12 = vector.load %arg6[%c0_9, %c0_10] : memref<32x128xf32, #tpu.memory_space<vmem>>, vector<32x128xf32>
      %cst_11 = arith.constant 2.500000e-01 : f32
      %13 = vector.broadcast %cst_11 : f32 to vector<32x128xf32>
      %14 = arith.mulf %12, %13 : vector<32x128xf32>
      %15 = arith.truncf %14 : vector<32x128xf32> to vector<32x128xbf16>
      %c0_12 = arith.constant 0 : index
      %c0_13 = arith.constant 0 : index
      %16 = vector.load %arg2[%c0_12, %c0_13] : memref<16x32xbf16, #tpu.memory_space<vmem>>, vector<16x32xbf16>
      %cst_14 = arith.constant dense<0.000000e+00> : vector<16x128xf32>
      %17 = tpu.matmul %16, %15, %cst_14 {dimension_numbers = #tpu.dot_dimension_numbers<[1], [0], [0], [1], [0, 0, 1, 1], [], []>} : vector<16x32xbf16>, vector<32x128xbf16>, vector<16x128xf32> -> vector<16x128xf32>
      %c0_15 = arith.constant 0 : index
      %c0_16 = arith.constant 0 : index
      %18 = vector.load %arg4[%c0_15, %c0_16] : memref<1x128xf32, #tpu.memory_space<vmem>>, vector<1x128xf32>
      %19 = vector.broadcast %18 : vector<1x128xf32> to vector<16x128xf32>
      %20 = arith.addf %17, %19 : vector<16x128xf32>
      %c0_17 = arith.constant 0 : index
      %c0_18 = arith.constant 0 : index
      %21 = vector.load %arg5[%c0_17, %c0_18] : memref<16x128xf32, #tpu.memory_space<vmem>>, vector<16x128xf32>
      tpu.vector_store %arg5[%c0_17, %c0_18], %20 {strides = array<i32>} : memref<16x128xf32, #tpu.memory_space<vmem>>, vector<16x128xf32>,
    } else {
    }
    return
  }
  func.func @transform_0(%arg0: i32, %arg1: i32) -> (i32, i32) {
    %c0_i32 = arith.constant 0 : i32
    %c0_i32_0 = arith.constant 0 : i32
    %c0_i32_1 = arith.constant 0 : i32
    return %c0_i32, %c0_i32_0 : i32, i32
  }
  func.func @transform_1(%arg0: i32, %arg1: i32) -> (i32, i32, i32) {
    %c0_i32 = arith.constant 0 : i32
    %c0_i32_0 = arith.constant 0 : i32
    return %arg1, %c0_i32, %arg0 : i32, i32, i32
  }
  func.func @transform_2(%arg0: i32, %arg1: i32) -> (i32, i32) {
    %c0_i32 = arith.constant 0 : i32
    %c0_i32_0 = arith.constant 0 : i32
    return %c0_i32, %arg0 : i32, i32
  }
  func.func @transform_3(%arg0: i32, %arg1: i32) -> (i32, i32) {
    %c0_i32 = arith.constant 0 : i32
    %c0_i32_0 = arith.constant 0 : i32
    return %c0_i32, %arg0 : i32, i32
  }
}

</mosaic_0001>

<bundles_post_ra>
// kernel: container_forward.1
= control target key start
LH: loop header
LB: loop body
LE: loop exit
PB: predicated region body
PF: predicated region fallthrough
CT: control target
= control target key end

     0   :  { %v213_v0 = vmov 0.0   ;;  %vm214_vm0 = vmmov 0   ;;  %vm106_vm1 = vcmask 261120   ;;  %s271_s1 = inlined_call_operand.vmem [shape: bf16[4,32,128], index: 1, kind: input, shape index: {}]   ;;  %s272_s0 = inlined_call_operand.vmem [shape: bf16[16,32], index: 0, kind: input, shape index: {}]   ;;  %s273_s2 = inlined_call_operand.vmem [shape: f32[1,128], index: 2, kind: input, shape index: {}]   ;;  %s274_s3 = inlined_call_operand.vmem [shape: f32[16,128], index: 3, kind: output, shape index: {}]  }
   0x1   :  { %202 = vmatprep.subr.bf16.mxu0 %v213_v0  ;;  %v161_v1 = vld [vmem:[%s271_s1] sm:$0xff]   ;;  %v193_v2 = vld [vmem:[%s271_s1 + $0x10] sm:$0xff]   ;;  %206 = vmatprep.mubr.msk.bf16.mxu0 %vm214_vm0, %v213_v0  ;;  %v192_v9 = vld [vmem:[%s271_s1 + $0x8] sm:$0xff]  }
   0x2   :  { %v195_v3 = vld [vmem:[%s271_s1 + $0x20] sm:$0xff]   ;;  %v162_v4 = vunpack.c.l.bf16 %v161_v1  ;;  %v163_v5 = vunpack.c.h.bf16 %v161_v1  ;;  %v170_v6 = vunpack.c.l.bf16 %v193_v2  ;;  %v171_v7 = vunpack.c.h.bf16 %v193_v2  ;;  %v197_v8 = vld [vmem:[%s271_s1 + $0x30] sm:$0xff]   ;;  %v194_v10 = vld [vmem:[%s271_s1 + $0x18] sm:$0xff]  }
   0x3   :  { %v178_v11 = vunpack.c.l.bf16 %v195_v3  ;;  %v179_v12 = vunpack.c.h.bf16 %v195_v3  ;;  %v186_v13 = vunpack.c.l.bf16 %v197_v8  ;;  %v187_v14 = vunpack.c.h.bf16 %v197_v8  ;;  %v196_v15 = vld [vmem:[%s271_s1 + $0x28] sm:$0xff]   ;;  %v198_v20 = vld [vmem:[%s271_s1 + $0x38] sm:$0xff]   ;;  %v212_v43 = vld [vmem:[%s272_s0] sm:$0xff]  }
   0x4   :  { %v59_v16 = vadd.f32 %v170_v6, %v162_v4  ;;  %v62_v17 = vadd.f32 %v171_v7, %v163_v5  ;;  %v166_v18 = vunpack.c.l.bf16 %v192_v9  ;;  %v167_v19 = vunpack.c.h.bf16 %v192_v9  ;;  %v157_v44 = vld [vmem:[%s273_s2] ss:$0 sm:$0xff] }
   0x5   :  { %v174_v21 = vunpack.c.l.bf16 %v194_v10  ;;  %v175_v22 = vunpack.c.h.bf16 %v194_v10  ;;  %v182_v23 = vunpack.c.l.bf16 %v196_v15  ;;  %v183_v24 = vunpack.c.h.bf16 %v196_v15 }
   0x6   :  { %v60_v25 = vadd.f32 %v178_v11, %v59_v16  ;;  %v63_v26 = vadd.f32 %v179_v12, %v62_v17  ;;  %v190_v27 = vunpack.c.l.bf16 %v198_v20  ;;  %v191_v28 = vunpack.c.h.bf16 %v198_v20 }
   0x7   :  { %v65_v29 = vadd.f32 %v174_v21, %v166_v18  ;;  %v68_v30 = vadd.f32 %v175_v22, %v167_v19 }
   0x8   :  { %v61_v31 = vadd.f32 %v186_v13, %v60_v25  ;;  %v64_v32 = vadd.f32 %v187_v14, %v63_v26 }
   0x9   :  { %v66_v33 = vadd.f32 %v182_v23, %v65_v29  ;;  %v69_v34 = vadd.f32 %v183_v24, %v68_v30 }
   0xa   :  { %v86_v35 = vmul.f32 0.25, %v61_v31  ;;  %v87_v36 = vmul.f32 0.25, %v64_v32 }
   0xb   :  { %v67_v37 = vadd.f32 %v190_v27, %v66_v33  ;;  %v70_v38 = vadd.f32 %v191_v28, %v69_v34 }
   0xc   :  { %v90_v39 = vpack.c.bf16 %v87_v36, %v86_v35 }
   0xd   :  { %v88_v40 = vmul.f32 0.25, %v67_v37  ;;  %v89_v41 = vmul.f32 0.25, %v70_v38 }
   0xe   :  { %203 = vmatpush3.bf16.msra.mxu0 %v90_v39 }
   0xf   :  { %204 = vmatprep.subr.bf16.mxu0 %v213_v0  ;;  %v91_v42 = vpack.c.bf16 %v89_v41, %v88_v40 }
  0x12   :  { %205 = vmatpush3.bf16.msra.mxu0 %v91_v42 }
  0x15   :  { %207 = vmatmul.mubr.msk.bf16.vlgmr.msra.gmra.mrb[0].mxu0 %vm106_vm1, %v212_v43 }
  0xe8   :  { %v144_v45 = vpop.f32.mrb[0].mxu0 }
  0xe9   :  { %v145_v46 = vadd.f32 %v157_v44, %v144_v45  ;;  %v208_v47 = vpop.f32.mrb[1].mxu0 }
  0xea   :  { %v147_v48 = vpop.f32.mrb[2].mxu0 }
  0xeb   :  { %151 = vst [vmem:[%s274_s3] sm:$0xff] %v145_v46  ;;  %v148_v49 = vadd.f32 %v157_v44, %v147_v48  ;;  %v209_v50 = vpop.f32.mrb[3].mxu0 }
  0xed   :  { %152 = vst [vmem:[%s274_s3 + $0x8] sm:$0xff] %v148_v49 }

</bundles_post_ra>
